<compile_context>
chip_gen: v7x
topology: tpu7x:2x2x1
jax: 0.10.0
libtpu: 0.0.40
codegen_flags: <defaults>
</compile_context>

<pallas_src>
import functools
import math

import jax
import jax.numpy as jnp
from jax.experimental import pallas as pl
from jax.experimental.pallas import tpu as pltpu

FPAD = 128  # lane-dense padded feature width (>= max(nhid, nclass))


# --------------------------- fused Pallas kernel ----------------------------
def _fused_gcn_kernel(fea_ref, adj_ref, w1_ref, w23_ref, b_ref, out_ref, *, nclass):
    adj = adj_ref[...]            # bf16 (N, N)
    fea = fea_ref[...]            # bf16 (N, NFEAT)

    # ---- Layer 1 (input GCN): aggregate-before-project ----------------------
    # (adj @ fea) @ W1' + fea @ W1_self' + b1'   — adj contracts the 16-wide raw
    # features instead of the 128-wide projection.
    ax = jnp.dot(adj, fea, preferred_element_type=jnp.float32)        # (N, NFEAT) f32
    h = (jnp.dot(ax.astype(jnp.bfloat16), w1_ref[:, :FPAD],
                 preferred_element_type=jnp.float32)
         + jnp.dot(fea, w1_ref[:, FPAD:], preferred_element_type=jnp.float32)
         + b_ref[0])
    h = jnp.maximum(h, 0.0)

    # ---- Layers 2/3: one wide [W | W_self] MXU matmul, then adj aggregation --
    def layer(x_f32, w, b, relu):
        x = x_f32.astype(jnp.bfloat16)
        s = jnp.dot(x, w, preferred_element_type=jnp.float32)         # (N, 2*FPAD)
        out = (jnp.dot(adj, s[:, :FPAD].astype(jnp.bfloat16),
                       preferred_element_type=jnp.float32)
               + s[:, FPAD:] + b)                                     # bias carries BN
        if relu:
            out = jnp.maximum(out, 0.0)
        return out

    h = layer(h, w23_ref[0], b_ref[1], relu=True)     # mid MultiLayerGCNBlock layer
    h = layer(h, w23_ref[1], b_ref[2], relu=False)    # output GCN layer

    # ---- log_softmax over the real `nclass` lanes, f32 throughout ------------
    lane = jax.lax.broadcasted_iota(jnp.int32, h.shape, dimension=1)
    mask = lane < nclass
    hm = jnp.where(mask, h, -1e30)
    m = jnp.max(hm, axis=-1, keepdims=True)
    z = hm - m
    e = jnp.where(mask, jnp.exp(z), 0.0)
    lse = jnp.log(jnp.sum(e, axis=-1, keepdims=True))
    out_ref[...] = z - lse        # full unmasked 128-lane store (padded lanes = junk)


# --------------------------- parameter preparation ---------------------------
def init_gcn_layer_params(key, fin, fout):
    """GraphConvolutionBS.reset_parameters: U(-stdv, stdv), stdv = 1/sqrt(fout).
    BatchNorm1d at init: gamma=1, beta=0, running_mean=0, running_var=1."""
    kw, kws, kb = jax.random.split(key, 3)
    stdv = 1.0 / math.sqrt(fout)
    return {
        "w": jax.random.uniform(kw, (fin, fout), jnp.float32, -stdv, stdv),
        "w_self": jax.random.uniform(kws, (fin, fout), jnp.float32, -stdv, stdv),
        "bias": jax.random.uniform(kb, (fout,), jnp.float32, -stdv, stdv),
        "bn_gamma": jnp.ones((fout,), jnp.float32),
        "bn_beta": jnp.zeros((fout,), jnp.float32),
        "bn_mean": jnp.zeros((fout,), jnp.float32),
        "bn_var": jnp.ones((fout,), jnp.float32),
    }


def _fold_bn(p):
    """Fold eval-mode BN (+ bias) into the weights: W'=W*s, Wself'=Wself*s,
    b'=bias*s+shift."""
    eps = 1e-5
    scale = p["bn_gamma"] / jnp.sqrt(p["bn_var"] + eps)
    shift = p["bn_beta"] - p["bn_mean"] * scale
    return (p["w"] * scale[None, :], p["w_self"] * scale[None, :],
            p["bias"] * scale + shift)


def _pad(a, rows, cols):
    r, c = a.shape
    return jnp.zeros((rows, cols), jnp.float32).at[:r, :c].set(a)


def prepare_fused_params(params, nfeat):
    """One-time constant transform:
      w1cat: (nfeat, 2*FPAD) bf16 = [W1' | W1_self'] (lane-concat, zero-padded)
      w23:   (2, FPAD, 2*FPAD) bf16 = stacked [Wk' | Wk_self'] for layers 2,3
      bias:  (3, 1, FPAD) f32 = stacked folded biases
    Padded rows/cols are zero, so they contribute exactly nothing."""
    w1, w1s, b1 = _fold_bn(params["ingc"])
    w2, w2s, b2 = _fold_bn(params["mid0"])
    w3, w3s, b3 = _fold_bn(params["outgc"])

    w1cat = jnp.concatenate([_pad(w1, nfeat, FPAD), _pad(w1s, nfeat, FPAD)], axis=1)
    w2cat = jnp.concatenate([_pad(w2, FPAD, FPAD), _pad(w2s, FPAD, FPAD)], axis=1)
    w3cat = jnp.concatenate([_pad(w3, FPAD, FPAD), _pad(w3s, FPAD, FPAD)], axis=1)
    w23 = jnp.stack([w2cat, w3cat], axis=0)

    def brow(b):
        return jnp.zeros((1, FPAD), jnp.float32).at[0, :b.shape[0]].set(b)
    bias = jnp.stack([brow(b1), brow(b2), brow(b3)], axis=0)

    return (w1cat.astype(jnp.bfloat16), w23.astype(jnp.bfloat16), bias)


# --------------------------------- wrapper -----------------------------------
def gcn_model1_forward(fused, fea, adj, nclass):
    """Full GCNModel1 forward (3 GraphConvolutionBS layers + log_softmax) in one
    Pallas kernel. Shapes are tiny, so everything lives in VMEM, no grid tiling.
    Returns the lane-dense padded (N, FPAD) slab; only the first `nclass` lanes
    are valid (consume them padded or slice in the consumer)."""
    n, nfeat = fea.shape
    w1, w23, bias = fused
    # At scale the caller should store adj/fea in bf16 directly; the cast here is
    # a one-off tiny convert at this size.
    operands = (fea.astype(jnp.bfloat16), adj.astype(jnp.bfloat16), w1, w23, bias)

    # Advisory cost estimate from the actual (padded) MXU work.
    flops = (2 * n * n * nfeat                      # adj @ fea          (layer 1)
             + 2 * 2 * n * nfeat * FPAD             # ax@W1 + fea@W1self (layer 1)
             + 2 * (2 * n * FPAD * 2 * FPAD         # x @ [W|Wself]      (layers 2,3)
                    + 2 * n * n * FPAD))            # adj @ neigh        (layers 2,3)
    bytes_accessed = sum(int(x.size) * x.dtype.itemsize for x in operands)
    bytes_accessed += n * FPAD * 4                  # output
    cost = pl.CostEstimate(flops=int(flops),
                           transcendentals=int(n * FPAD + n),
                           bytes_accessed=int(bytes_accessed))

    vmem = pl.BlockSpec(memory_space=pltpu.MemorySpace.VMEM)
    kernel = functools.partial(_fused_gcn_kernel, nclass=nclass)
    return pl.pallas_call(
        kernel,
        out_shape=jax.ShapeDtypeStruct((n, FPAD), jnp.float32),
        in_specs=[vmem] * len(operands),
        out_specs=vmem,
        cost_estimate=cost,
    )(*operands)


# ----------------------- pure-JAX references (for checking) ------------------
def _ref_layer(x, adj, p, relu, log_softmax):
    eps = 1e-5
    out = adj @ (x @ p["w"]) + x @ p["w_self"] + p["bias"]
    out = (out - p["bn_mean"]) / jnp.sqrt(p["bn_var"] + eps) * p["bn_gamma"] + p["bn_beta"]
    if relu:
        out = jnp.maximum(out, 0.0)
    if log_softmax:
        out = jax.nn.log_softmax(out, axis=1)
    return out


def gcn_model1_ref(params, fea, adj):
    """Exact f32 module semantics."""
    x = _ref_layer(fea, adj, params["ingc"], True, False)
    x = _ref_layer(x, adj, params["mid0"], True, False)
    x = _ref_layer(x, adj, params["outgc"], False, True)
    return x


def gcn_model1_matched_ref(fused, fea, adj, nclass):
    """Reference that mirrors the kernel's bf16 operand quantization and f32
    accumulation, for a tight check of the kernel logic itself."""
    w1, w23, bias = fused
    f32 = lambda a: a.astype(jnp.float32)
    feb, adb = fea.astype(jnp.bfloat16), adj.astype(jnp.bfloat16)

    ax = f32(adb) @ f32(feb)
    h = (f32(ax.astype(jnp.bfloat16)) @ f32(w1[:, :FPAD])
         + f32(feb) @ f32(w1[:, FPAD:]) + bias[0])
    h = jnp.maximum(h, 0.0)
    for i, relu in ((0, True), (1, False)):
        xb = h.astype(jnp.bfloat16)
        s = f32(xb) @ f32(w23[i])
        h = f32(adb) @ f32(s[:, :FPAD].astype(jnp.bfloat16)) + s[:, FPAD:] + bias[i + 1]
        if relu:
            h = jnp.maximum(h, 0.0)
    return jax.nn.log_softmax(h[:, :nclass], axis=1)


# ----------------------------------- main ------------------------------------
if __name__ == "__main__":
    N_NODES, NFEAT, NHID, NCLASS = 16, 16, 32, 8

    root = jax.random.PRNGKey(0)
    k_fea, k_adj, k_in, k_mid, k_out = jax.random.split(root, 5)

    # Deterministic inputs
    fea = jax.random.normal(k_fea, (N_NODES, NFEAT), jnp.float32)

    # Random symmetric graph, add self loops, symmetric normalization
    a = (jax.random.uniform(k_adj, (N_NODES, N_NODES)) < 0.3).astype(jnp.float32)
    a = jnp.maximum(a, a.T)
    a = a + jnp.eye(N_NODES, dtype=jnp.float32)
    d_inv_sqrt = 1.0 / jnp.sqrt(jnp.sum(a, axis=1))
    adj = a * d_inv_sqrt[:, None] * d_inv_sqrt[None, :]

    params = {
        "ingc": init_gcn_layer_params(k_in, NFEAT, NHID),
        "mid0": init_gcn_layer_params(k_mid, NHID, NHID),
        "outgc": init_gcn_layer_params(k_out, NHID, NCLASS),
    }
    fused = prepare_fused_params(params, NFEAT)  # one-time constant transform

    out_pad = jax.block_until_ready(gcn_model1_forward(fused, fea, adj, NCLASS))
    out = out_pad[:, :NCLASS]                    # slice only at the consumer

    ref_matched = jax.block_until_ready(gcn_model1_matched_ref(fused, fea, adj, NCLASS))
    ref_exact = jax.block_until_ready(gcn_model1_ref(params, fea, adj))

    assert out.shape == (N_NODES, NCLASS)
    # Tight check of kernel logic (same bf16 quantization, f32 accumulation).
    assert jnp.allclose(out, ref_matched, atol=2e-3, rtol=2e-3), "mismatch vs matched ref"
    # Loose check vs exact f32 module semantics (bf16 MXU operand quantization).
    assert jnp.allclose(out, ref_exact, atol=1e-1, rtol=1e-1), "mismatch vs exact ref"
    print("KERNEL_OK")
</pallas_src>

<mosaic_0001>
module attributes {stable_mosaic.version = 11 : i64} {
  func.func @_fused_gcn_kernel(%arg0: memref<16x16xbf16, #tpu.memory_space<vmem>>, %arg1: memref<16x16xbf16, #tpu.memory_space<vmem>>, %arg2: memref<16x256xbf16, #tpu.memory_space<vmem>>, %arg3: memref<2x128x256xbf16, #tpu.memory_space<vmem>>, %arg4: memref<3x1x128xf32, #tpu.memory_space<vmem>>, %arg5: memref<16x128xf32, #tpu.memory_space<vmem>>) attributes {dimension_semantics = [], scalar_prefetch = 0 : i64, scratch_operands = 0 : i64, tpu.core_type = #tpu.core_type<tc>} {
    %c0 = arith.constant 0 : index
    %c0_0 = arith.constant 0 : index
    %0 = vector.load %arg1[%c0, %c0_0] : memref<16x16xbf16, #tpu.memory_space<vmem>>, vector<16x16xbf16>
    %c0_1 = arith.constant 0 : index
    %c0_2 = arith.constant 0 : index
    %1 = vector.load %arg0[%c0_1, %c0_2] : memref<16x16xbf16, #tpu.memory_space<vmem>>, vector<16x16xbf16>
    %cst = arith.constant dense<0.000000e+00> : vector<16x16xf32>
    %2 = tpu.matmul %0, %1, %cst {dimension_numbers = #tpu.dot_dimension_numbers<[1], [0], [0], [1], [0, 0, 1, 1], [], []>} : vector<16x16xbf16>, vector<16x16xbf16>, vector<16x16xf32> -> vector<16x16xf32>
    %3 = arith.truncf %2 : vector<16x16xf32> to vector<16x16xbf16>
    %c0_3 = arith.constant 0 : index
    %c0_4 = arith.constant 0 : index
    %4 = vector.load %arg2[%c0_3, %c0_4] : memref<16x256xbf16, #tpu.memory_space<vmem>>, vector<16x128xbf16>
    %cst_5 = arith.constant dense<0.000000e+00> : vector<16x128xf32>
    %5 = tpu.matmul %3, %4, %cst_5 {dimension_numbers = #tpu.dot_dimension_numbers<[1], [0], [0], [1], [0, 0, 1, 1], [], []>} : vector<16x16xbf16>, vector<16x128xbf16>, vector<16x128xf32> -> vector<16x128xf32>
    %c0_6 = arith.constant 0 : index
    %c128 = arith.constant 128 : index
    %6 = vector.load %arg2[%c0_6, %c128] : memref<16x256xbf16, #tpu.memory_space<vmem>>, vector<16x128xbf16>
    %cst_7 = arith.constant dense<0.000000e+00> : vector<16x128xf32>
    %7 = tpu.matmul %1, %6, %cst_7 {dimension_numbers = #tpu.dot_dimension_numbers<[1], [0], [0], [1], [0, 0, 1, 1], [], []>} : vector<16x16xbf16>, vector<16x128xbf16>, vector<16x128xf32> -> vector<16x128xf32>
    %8 = arith.addf %5, %7 : vector<16x128xf32>
    %c0_8 = arith.constant 0 : index
    %c0_9 = arith.constant 0 : index
    %c0_10 = arith.constant 0 : index
    %9 = vector.load %arg4[%c0_8, %c0_9, %c0_10] : memref<3x1x128xf32, #tpu.memory_space<vmem>>, vector<1x1x128xf32>
    %10 = vector.shape_cast %9 : vector<1x1x128xf32> to vector<1x128xf32>
    %11 = vector.broadcast %10 : vector<1x128xf32> to vector<16x128xf32>
    %12 = arith.addf %8, %11 : vector<16x128xf32>
    %cst_11 = arith.constant 0.000000e+00 : f32
    %13 = vector.broadcast %cst_11 : f32 to vector<16x128xf32>
    %14 = arith.maximumf %12, %13 : vector<16x128xf32>
    %c0_12 = arith.constant 0 : index
    %c0_13 = arith.constant 0 : index
    %c0_14 = arith.constant 0 : index
    %15 = vector.load %arg3[%c0_12, %c0_13, %c0_14] : memref<2x128x256xbf16, #tpu.memory_space<vmem>>, vector<1x128x256xbf16>
    %16 = vector.shape_cast %15 : vector<1x128x256xbf16> to vector<128x256xbf16>
    %c1 = arith.constant 1 : index
    %c0_15 = arith.constant 0 : index
    %c0_16 = arith.constant 0 : index
    %17 = vector.load %arg4[%c1, %c0_15, %c0_16] : memref<3x1x128xf32, #tpu.memory_space<vmem>>, vector<1x1x128xf32>
    %18 = vector.shape_cast %17 : vector<1x1x128xf32> to vector<1x128xf32>
    %19 = arith.truncf %14 : vector<16x128xf32> to vector<16x128xbf16>
    %cst_17 = arith.constant dense<0.000000e+00> : vector<16x256xf32>
    %20 = tpu.matmul %19, %16, %cst_17 {dimension_numbers = #tpu.dot_dimension_numbers<[1], [0], [0], [1], [0, 0, 1, 1], [], []>} : vector<16x128xbf16>, vector<128x256xbf16>, vector<16x256xf32> -> vector<16x256xf32>
    %21 = vector.extract_strided_slice %20 {offsets = [0, 0], sizes = [16, 128], strides = [1, 1]} : vector<16x256xf32> to vector<16x128xf32>
    %22 = arith.truncf %21 : vector<16x128xf32> to vector<16x128xbf16>
    %cst_18 = arith.constant dense<0.000000e+00> : vector<16x128xf32>
    %23 = tpu.matmul %0, %22, %cst_18 {dimension_numbers = #tpu.dot_dimension_numbers<[1], [0], [0], [1], [0, 0, 1, 1], [], []>} : vector<16x16xbf16>, vector<16x128xbf16>, vector<16x128xf32> -> vector<16x128xf32>
    %24 = vector.extract_strided_slice %20 {offsets = [0, 128], sizes = [16, 128], strides = [1, 1]} : vector<16x256xf32> to vector<16x128xf32>
    %25 = arith.addf %23, %24 : vector<16x128xf32>
    %26 = vector.broadcast %18 : vector<1x128xf32> to vector<16x128xf32>
    %27 = arith.addf %25, %26 : vector<16x128xf32>
    %cst_19 = arith.constant 0.000000e+00 : f32
    %28 = vector.broadcast %cst_19 : f32 to vector<16x128xf32>
    %29 = arith.maximumf %27, %28 : vector<16x128xf32>
    %c1_20 = arith.constant 1 : index
    %c0_21 = arith.constant 0 : index
    %c0_22 = arith.constant 0 : index
    %30 = vector.load %arg3[%c1_20, %c0_21, %c0_22] : memref<2x128x256xbf16, #tpu.memory_space<vmem>>, vector<1x128x256xbf16>
    %31 = vector.shape_cast %30 : vector<1x128x256xbf16> to vector<128x256xbf16>
    %c2 = arith.constant 2 : index
    %c0_23 = arith.constant 0 : index
    %c0_24 = arith.constant 0 : index
    %32 = vector.load %arg4[%c2, %c0_23, %c0_24] : memref<3x1x128xf32, #tpu.memory_space<vmem>>, vector<1x1x128xf32>
    %33 = vector.shape_cast %32 : vector<1x1x128xf32> to vector<1x128xf32>
    %34 = arith.truncf %29 : vector<16x128xf32> to vector<16x128xbf16>
    %cst_25 = arith.constant dense<0.000000e+00> : vector<16x256xf32>
    %35 = tpu.matmul %34, %31, %cst_25 {dimension_numbers = #tpu.dot_dimension_numbers<[1], [0], [0], [1], [0, 0, 1, 1], [], []>} : vector<16x128xbf16>, vector<128x256xbf16>, vector<16x256xf32> -> vector<16x256xf32>
    %36 = vector.extract_strided_slice %35 {offsets = [0, 0], sizes = [16, 128], strides = [1, 1]} : vector<16x256xf32> to vector<16x128xf32>
    %37 = arith.truncf %36 : vector<16x128xf32> to vector<16x128xbf16>
    %cst_26 = arith.constant dense<0.000000e+00> : vector<16x128xf32>
    %38 = tpu.matmul %0, %37, %cst_26 {dimension_numbers = #tpu.dot_dimension_numbers<[1], [0], [0], [1], [0, 0, 1, 1], [], []>} : vector<16x16xbf16>, vector<16x128xbf16>, vector<16x128xf32> -> vector<16x128xf32>
    %39 = vector.extract_strided_slice %35 {offsets = [0, 128], sizes = [16, 128], strides = [1, 1]} : vector<16x256xf32> to vector<16x128xf32>
    %40 = arith.addf %38, %39 : vector<16x128xf32>
    %41 = vector.broadcast %33 : vector<1x128xf32> to vector<16x128xf32>
    %42 = arith.addf %40, %41 : vector<16x128xf32>
    %43 = tpu.iota {dimensions = array<i32: 1>} : vector<16x128xi32>
    %c8_i32 = arith.constant 8 : i32
    %44 = vector.broadcast %c8_i32 : i32 to vector<16x128xi32>
    %45 = arith.cmpi slt, %43, %44 : vector<16x128xi32>
    %cst_27 = arith.constant -1.000000e+30 : f32
    %46 = vector.broadcast %cst_27 : f32 to vector<16x128xf32>
    %47 = arith.select %45, %42, %46 : vector<16x128xi1>, vector<16x128xf32>
    %cst_28 = arith.constant dense<0xFF800000> : vector<16xf32>
    %48 = vector.multi_reduction <maximumf>, %47, %cst_28 [1] : vector<16x128xf32> to vector<16xf32>
    %49 = vector.shape_cast %48 : vector<16xf32> to vector<16x1xf32>
    %50 = vector.broadcast %49 : vector<16x1xf32> to vector<16x128xf32>
    %51 = arith.subf %47, %50 : vector<16x128xf32>
    %52 = math.exp %51 : vector<16x128xf32>
    %cst_29 = arith.constant 0.000000e+00 : f32
    %53 = vector.broadcast %cst_29 : f32 to vector<16x128xf32>
    %54 = arith.select %45, %52, %53 : vector<16x128xi1>, vector<16x128xf32>
    %cst_30 = arith.constant dense<0.000000e+00> : vector<16xf32>
    %55 = vector.multi_reduction <add>, %54, %cst_30 [1] : vector<16x128xf32> to vector<16xf32>
    %56 = vector.shape_cast %55 : vector<16xf32> to vector<16x1xf32>
    %57 = math.log %56 : vector<16x1xf32>
    %58 = vector.broadcast %57 : vector<16x1xf32> to vector<16x128xf32>
    %59 = arith.subf %51, %58 : vector<16x128xf32>
    %c0_31 = arith.constant 0 : index
    %c0_32 = arith.constant 0 : index
    %60 = vector.load %arg5[%c0_31, %c0_32] : memref<16x128xf32, #tpu.memory_space<vmem>>, vector<16x128xf32>
    tpu.vector_store %arg5[%c0_31, %c0_32], %59 {strides = array<i32>} : memref<16x128xf32, #tpu.memory_space<vmem>>, vector<16x128xf32>,
    return
  }
}

</mosaic_0001>

<bundles_post_ra>
// kernel: tpu_custom_call.1
= control target key start
LH: loop header
LB: loop body
LE: loop exit
PB: predicated region body
PF: predicated region fallthrough
CT: control target
= control target key end

     0   :  { %10 = vsyncpa [#allocation3], 0  ;;  %s1120_s0 = inlined_call_operand.hbm [shape: bf16[16,16], index: 0, kind: input, shape index: {}]   ;;  %s1121_s1 = inlined_call_operand.hbm [shape: bf16[16,16], index: 1, kind: input, shape index: {}]   ;;  %s1122_s2 = inlined_call_operand.hbm [shape: bf16[16,256], index: 2, kind: input, shape index: {}]   ;;  %s1123_s3 = inlined_call_operand.hbm [shape: bf16[2,128,256], index: 3, kind: input, shape index: {}]   ;;  %s1124_s4 = inlined_call_operand.vmem [shape: f32[3,1,128], index: 4, kind: input, shape index: {}]   ;;  %s1125_s5 = inlined_call_operand.hbm [shape: f32[16,128], index: 5, kind: output, shape index: {}]  }
   0x1   :  { %11 = vsyncpa [#allocation6], 0 }
   0x2   :  { %12 = vsyncpa [#allocation9], 0 }
   0x3   :  { %13 = vsyncpa [#allocation4], 0  ;;  %s964_s18 = smov [#allocation5]   ;;  %s965_s20 = smov [#allocation2]  }
   0x4   :  { %s31_s19 = sshll.u32 %s964_s18, 4  ;;  %s19_s21 = sshll.u32 %s965_s20, 4  ;;  %s32_s19 = int_to_ptr.vmem [resolvable:$true] %s31_s19  ;;  %s1006_s21 = int_to_ptr.vmem [resolvable:$true] %s19_s21 }
   0x5   :  { %s846_s24 = scalar_lea.hbm %s1121_s1, 128 }
   0x6   :  { %p847_p0 = scmp.ne.s32.totalorder %s1121_s1, %s846_s24  ;;  %p850_p1 = scmp.lt.u32.totalorder %s846_s24, %s1121_s1 }
   0x8   :  { %p852_p2 = pnand %p850_p1, %p847_p0 }
   0xa   :  { %855 = shalt.err (!%p852_p2)
}
   0xb   :  { %s856_s29 = scalar_lea.vmem %s32_s19, 128  ;;  %p861_p4 = scmp.lt.s32.totalorder %s32_s19, %s32_s19 }
   0xc   :  { %p857_p3 = scmp.ne.s32.totalorder %s32_s19, %s856_s29  ;;  %p862_p5 = scmp.lt.s32.totalorder %s856_s29, %s856_s29 }
   0xe   :  { %p863_p6 = por %p862_p5, %p861_p4 }
  0x10   :  { %p864_p7 = pnand %p863_p6, %p857_p3 }
  0x12   :  { %867 = shalt.err (!%p864_p7)
}
  0x13   :  { %s966_s30 = smov 64   ;;  %s967_s6 = smov 4  }
  0x14   :  { %37 = dma.hbm_to_vmem [thread:$0]  %s1121_s1, 128, %s32_s19, [#allocation6], %s966_s30, %s966_s30, %s967_s6  }
  0x15   :  { %s868_s11 = scalar_lea.hbm %s1120_s0, 128 }
  0x16   :  { %p869_p8 = scmp.ne.s32.totalorder %s1120_s0, %s868_s11  ;;  %p872_p9 = scmp.lt.u32.totalorder %s868_s11, %s1120_s0 }
  0x18   :  { %p874_p10 = pnand %p872_p9, %p869_p8 }
  0x1a   :  { %877 = shalt.err (!%p874_p10)
}
  0x1b   :  { %s878_s16 = scalar_lea.vmem %s1006_s21, 128  ;;  %p883_p12 = scmp.lt.s32.totalorder %s1006_s21, %s1006_s21 }
  0x1c   :  { %p879_p11 = scmp.ne.s32.totalorder %s1006_s21, %s878_s16  ;;  %p884_p13 = scmp.lt.s32.totalorder %s878_s16, %s878_s16 }
  0x1e   :  { %p885_p0 = por %p884_p13, %p883_p12 }
  0x20   :  { %p886_p1 = pnand %p885_p0, %p879_p11 }
  0x22   :  { %889 = shalt.err (!%p886_p1)
}
  0x23   :  { %25 = dma.hbm_to_vmem [thread:$0]  %s1120_s0, 128, %s1006_s21, [#allocation3], %s966_s30, %s966_s30, %s967_s6  }
  0x24   :  { %s968_s18 = smov [#allocation7]   ;;  %s890_s23 = scalar_lea.hbm %s1122_s2, 256 }
  0x25   :  { %s43_s19 = sshll.u32 %s968_s18, 4  ;;  %p891_p2 = scmp.ne.s32.totalorder %s1122_s2, %s890_s23  ;;  %s44_s19 = int_to_ptr.vmem [resolvable:$true] %s43_s19 }
  0x26   :  { %p894_p3 = scmp.lt.u32.totalorder %s890_s23, %s1122_s2 }
  0x28   :  { %p896_p4 = pnand %p894_p3, %p891_p2 }
  0x2a   :  { %899 = shalt.err (!%p896_p4)
}
  0x2b   :  { %s900_s28 = scalar_lea.vmem %s44_s19, 256  ;;  %p905_p6 = scmp.lt.s32.totalorder %s44_s19, %s44_s19 }
  0x2c   :  { %p901_p5 = scmp.ne.s32.totalorder %s44_s19, %s900_s28  ;;  %p906_p7 = scmp.lt.s32.totalorder %s900_s28, %s900_s28 }
  0x2e   :  { %p907_p8 = por %p906_p7, %p905_p6 }
  0x30   :  { %p908_p9 = pnand %p907_p8, %p901_p5 }
  0x32   :  { %911 = shalt.err (!%p908_p9)
}
  0x33   :  { %s969_s0 = smov 128   ;;  %s970_s21 = smov 8  }
  0x34   :  { %49 = dma.hbm_to_vmem [thread:$0]  %s1122_s2, 256, %s44_s19, [#allocation6], %s969_s0, %s969_s0, %s970_s21  }
  0x35   :  { %s971_s6 = smov [#allocation8]   ;;  %s912_s10 = scalar_lea.hbm %s1123_s3, 4096 }
  0x36   :  { %s55_s7 = sshll.u32 %s971_s6, 4  ;;  %p913_p10 = scmp.ne.s32.totalorder %s1123_s3, %s912_s10  ;;  %s56_s7 = int_to_ptr.vmem [resolvable:$true] %s55_s7 }
  0x37   :  { %p916_p11 = scmp.lt.u32.totalorder %s912_s10, %s1123_s3 }
  0x39   :  { %p918_p12 = pnand %p916_p11, %p913_p10 }
  0x3b   :  { %921 = shalt.err (!%p918_p12)
}
  0x3c   :  { %s922_s15 = scalar_lea.vmem %s56_s7, 4096  ;;  %p927_p0 = scmp.lt.s32.totalorder %s56_s7, %s56_s7 }
  0x3d   :  { %p923_p13 = scmp.ne.s32.totalorder %s56_s7, %s922_s15  ;;  %p928_p1 = scmp.lt.s32.totalorder %s922_s15, %s922_s15 }
  0x3f   :  { %p929_p2 = por %p928_p1, %p927_p0 }
  0x41   :  { %p930_p3 = pnand %p929_p2, %p923_p13 }
  0x43   :  { %933 = shalt.err (!%p930_p3)
}
  0x44   :  { %61 = dma.hbm_to_vmem [thread:$0]  %s1123_s3, 4096, %s56_s7, [#allocation9], %s969_s0, %s969_s0, %s970_s21  }
  0x45   :  { %956 = dma.done.wait [#allocation3], 128  }
  0x46   :  { %957 = vsyncadd [#allocation3], 4294967168 }
  0x47   :  { %958 = dma.done.wait [#allocation6], 384  }
  0x48   :  { %959 = vsyncadd [#allocation6], 4294966912 }
  0x49   :  { %960 = dma.done.wait [#allocation9], 4096  }
  0x4a   :  { %961 = vsyncadd [#allocation9], 4294963200  ;;  %v972_v0 = vmov 0.0   ;;  %vm973_vm0 = vmmov 0   ;;  %v786_v1 = vld [vmem:[#allocation2] sm:$0xff]   ;;  %v1073_v2 = vld [vmem:[#allocation5] sm:$0xff]  }
  0x4b   :  { %744 = vmatprep.subr.bf16.mxu0 %v972_v0  ;;  %746 = vmatprep.mubr.msk.bf16.mxu0 %vm973_vm0, %v972_v0  ;;  %vm92_vm1 = vcmask 130048   ;;  %v788_v3 = vld [vmem:[#allocation7 + $0x4] ss:$8 sps:$4 sm:$0xff]   ;;  %v789_v4 = vld [vmem:[#allocation7] ss:$8 sps:$4 sm:$0xff]   ;;  %v974_v30 = vmov 0  }
  0x4c   :  { %750 = vmatprep.subr.bf16.mxu1 %v972_v0  ;;  %752 = vmatprep.mubr.msk.bf16.mxu1 %vm973_vm0, %v972_v0  ;;  %v790_v5 = vld [vmem:[#allocation8] ss:$8 sps:$4 sm:$0xff]   ;;  %v792_v6 = vld [vmem:[#allocation8 + $0x4] ss:$8 sps:$4 sm:$0xff]   ;;  %v795_v7 = vld [vmem:[#allocation8 + $0x14] ss:$8 sps:$4 sm:$0xff]  }
  0x4d   :  { %745 = vmatpush3.bf16.msra.mxu0 %v786_v1  ;;  %751 = vmatpush3.bf16.msra.mxu1 %v788_v3  ;;  %v793_v8 = vld [vmem:[#allocation8 + $0x10] ss:$8 sps:$4 sm:$0xff]   ;;  %v798_v9 = vld [vmem:[#allocation8 + $0x24] ss:$8 sps:$4 sm:$0xff]   ;;  %v796_v10 = vld [vmem:[#allocation8 + $0x20] ss:$8 sps:$4 sm:$0xff]  }
  0x4e   :  { %756 = vmatprep.subr.bf16.mxu0 %v972_v0  ;;  %352 = vmatprep.subr.bf16.mxu1 %v792_v6  ;;  %v801_v11 = vld [vmem:[#allocation8 + $0x34] ss:$8 sps:$4 sm:$0xff]   ;;  %v799_v12 = vld [vmem:[#allocation8 + $0x30] ss:$8 sps:$4 sm:$0xff]   ;;  %v804_v13 = vld [vmem:[#allocation8 + $0x44] ss:$8 sps:$4 sm:$0xff]  }
  0x4f   :  { %v802_v14 = vld [vmem:[#allocation8 + $0x40] ss:$8 sps:$4 sm:$0xff]   ;;  %v807_v15 = vld [vmem:[#allocation8 + $0x54] ss:$8 sps:$4 sm:$0xff]   ;;  %v805_v16 = vld [vmem:[#allocation8 + $0x50] ss:$8 sps:$4 sm:$0xff]  }
  0x50   :  { %747 = vmatmul.mubr.msk.bf16.vlgmr.msra.gmra.mrb[0].mxu0 %vm92_vm1, %v1073_v2  ;;  %753 = vmatmul.mubr.msk.bf16.vlgmr.msra.gmra.mrb[0].mxu1 %vm92_vm1, %v786_v1  ;;  %v810_v26 = vld [vmem:[#allocation8 + $0x64] ss:$8 sps:$4 sm:$0xff]   ;;  %v808_v27 = vld [vmem:[#allocation8 + $0x60] ss:$8 sps:$4 sm:$0xff]   ;;  %v813_v28 = vld [vmem:[#allocation8 + $0x74] ss:$8 sps:$4 sm:$0xff]  }
  0x51   :  { %758 = vmatprep.mubr.msk.bf16.mxu0 %vm973_vm0, %v972_v0  ;;  %757 = vmatpush3.bf16.msra.mxu0 %v789_v4  ;;  %v811_v29 = vld [vmem:[#allocation8 + $0x70] ss:$8 sps:$4 sm:$0xff]   ;;  %v695_v32 = vld [vmem:[%s1124_s4] ss:$0 sm:$0xff]  ;;  %v816_v46 = vld [vmem:[#allocation8 + $0x84] ss:$8 sps:$4 sm:$0xff]  }
  0x52   :  { %762 = vmatprep.subr.bf16.mxu0 %v972_v0  ;;  %353 = vmatpush1.bf16.msra.mxu1 %v790_v5  ;;  %v814_v49 = vld [vmem:[#allocation8 + $0x80] ss:$8 sps:$4 sm:$0xff]   ;;  %v819_v50 = vld [vmem:[#allocation8 + $0x94] ss:$8 sps:$4 sm:$0xff]   ;;  %v817_v51 = vld [vmem:[#allocation8 + $0x90] ss:$8 sps:$4 sm:$0xff]  }
  0x53   :  { %354 = vmatprep.subr.bf16.mxu1 %v795_v7  ;;  %384 = vmatprep.mubr.bf16.mxu1 %v974_v30  ;;  %v822_v52 = vld [vmem:[#allocation8 + $0xa4] ss:$8 sps:$4 sm:$0xff]   ;;  %v820_v53 = vld [vmem:[#allocation8 + $0xa0] ss:$8 sps:$4 sm:$0xff]   ;;  %v825_v54 = vld [vmem:[#allocation8 + $0xb4] ss:$8 sps:$4 sm:$0xff]  }
  0x54   :  { %v823_v55 = vld [vmem:[#allocation8 + $0xb0] ss:$8 sps:$4 sm:$0xff]   ;;  %v828_v56 = vld [vmem:[#allocation8 + $0xc4] ss:$8 sps:$4 sm:$0xff]   ;;  %v826_v57 = vld [vmem:[#allocation8 + $0xc0] ss:$8 sps:$4 sm:$0xff]  }
  0x55   :  { %v831_v58 = vld [vmem:[#allocation8 + $0xd4] ss:$8 sps:$4 sm:$0xff]   ;;  %v829_v59 = vld [vmem:[#allocation8 + $0xd0] ss:$8 sps:$4 sm:$0xff]   ;;  %v834_v60 = vld [vmem:[#allocation8 + $0xe4] ss:$8 sps:$4 sm:$0xff]  }
  0x56   :  { %355 = vmatpush1.bf16.msra.mxu1 %v793_v8  ;;  %v832_v61 = vld [vmem:[#allocation8 + $0xe0] ss:$8 sps:$4 sm:$0xff]   ;;  %v837_v62 = vld [vmem:[#allocation8 + $0xf4] ss:$8 sps:$4 sm:$0xff]   ;;  %v835_v63 = vld [vmem:[#allocation8 + $0xf0] ss:$8 sps:$4 sm:$0xff]  }
  0x57   :  { %356 = vmatprep.subr.bf16.mxu1 %v798_v9 }
  0x5a   :  { %357 = vmatpush1.bf16.msra.mxu1 %v796_v10 }
  0x5b   :  { %358 = vmatprep.subr.bf16.mxu1 %v801_v11 }
  0x5e   :  { %359 = vmatpush1.bf16.msra.mxu1 %v799_v12 }
  0x5f   :  { %360 = vmatprep.subr.bf16.mxu1 %v804_v13 }
  0x62   :  { %361 = vmatpush1.bf16.msra.mxu1 %v802_v14 }
  0x63   :  { %362 = vmatprep.subr.bf16.mxu1 %v807_v15 }
  0x66   :  { %363 = vmatpush1.bf16.msra.mxu1 %v805_v16 }
  0x67   :  { %364 = vmatprep.subr.bf16.mxu1 %v810_v26 }
  0x6a   :  { %365 = vmatpush1.bf16.msra.mxu1 %v808_v27 }
  0x6b   :  { %366 = vmatprep.subr.bf16.mxu1 %v813_v28 }
  0x6e   :  { %367 = vmatpush1.bf16.msra.mxu1 %v811_v29 }
  0x6f   :  { %768 = vmatprep.subr.bf16.mxu1 %v972_v0 }
 0x123   :  { %v130_v17 = vpop.f32.mrb[0].mxu0  ;;  %v185_v20 = vpop.f32.mrb[0].mxu1 }
 0x124   :  { %v748_v18 = vpop.f32.mrb[1].mxu0  ;;  %v754_v23 = vpop.f32.mrb[1].mxu1 }
 0x125   :  { %v133_v19 = vpop.f32.mrb[2].mxu0  ;;  %v188_v24 = vpop.f32.mrb[2].mxu1  ;;  %v640_v18 = vlaneseq }
 0x126   :  { %v137_v21 = vpack.c.bf16 %v133_v19, %v130_v17  ;;  %v749_v22 = vpop.f32.mrb[3].mxu0  ;;  %v755_v25 = vpop.f32.mrb[3].mxu1 }
 0x127   :  { %v641_v19 = vand.u32 127, %v640_v18 }
 0x128   :  { %759 = vmatmul.mubr.msk.bf16.vlgmr.msra.gmra.mrb[4].mxu0 %vm92_vm1, %v137_v21  ;;  %v733_v21 = vld [vmem:[%s1124_s4 + $0x2] ss:$0 sm:$0xff] }
 0x129   :  { %764 = vmatprep.mubr.msk.bf16.mxu0 %vm973_vm0, %v972_v0  ;;  %vm642_vm2 = vcmp.lt.s32.totalorder %v641_v19, 8 }
 0x1fb   :  { %v235_v31 = vpop.f32.mrb[4].mxu0 }
 0x1fc   :  { %v236_v33 = vadd.f32 %v235_v31, %v185_v20  ;;  %v760_v34 = vpop.f32.mrb[5].mxu0 }
 0x1fd   :  { %v238_v35 = vpop.f32.mrb[6].mxu0 }
 0x1fe   :  { %v249_v36 = vadd.f32 %v695_v32, %v236_v33  ;;  %v239_v37 = vadd.f32 %v238_v35, %v188_v24  ;;  %v761_v38 = vpop.f32.mrb[7].mxu0 }
 0x200   :  { %v250_v39 = vadd.f32 %v695_v32, %v239_v37  ;;  %v251_v40 = vmax.f32 %v249_v36, 0.0 }
 0x202   :  { %v252_v41 = vmax.f32 %v250_v39, 0.0 }
 0x204   :  { %v271_v42 = vpack.c.bf16 %v252_v41, %v251_v40 }
 0x206   :  { %385 = vmatmul.mubr.bf16.vlgmr.msra.gmra.mrb[4].mxu1 %v271_v42 }
 0x207   :  { %770 = vmatprep.mubr.msk.bf16.mxu1 %vm973_vm0, %v972_v0  ;;  %v714_v0 = vld [vmem:[%s1124_s4 + $0x1] ss:$0 sm:$0xff]  ;;  %s975_s4 = smov [#allocation10]  }
 0x208   :  { %s674_s22 = sshll.u32 %s975_s4, 4  ;;  %s675_s22 = int_to_ptr.vmem [resolvable:$true] %s674_s22 }
 0x209   :  { %s934_s23 = scalar_lea.vmem %s675_s22, 256  ;;  %p939_p5 = scmp.lt.s32.totalorder %s675_s22, %s675_s22 }
 0x20a   :  { %p935_p4 = scmp.ne.s32.totalorder %s675_s22, %s934_s23  ;;  %p940_p6 = scmp.lt.s32.totalorder %s934_s23, %s934_s23 }
 0x20c   :  { %p941_p7 = por %p940_p6, %p939_p5 }
 0x20e   :  { %p942_p8 = pnand %p941_p7, %p935_p4 }
 0x2d9   :  { %v386_v43 = vpop.f32.mrb[4].mxu1 }
 0x2da   :  { %v388_v44 = vpop.f32.mrb[5].mxu1 }
 0x2db   :  { %v390_v45 = vpop.f32.mrb[6].mxu1 }
 0x2dc   :  { %v395_v47 = vpack.c.bf16 %v390_v45, %v386_v43  ;;  %v392_v48 = vpop.f32.mrb[7].mxu1 }
 0x2de   :  { %763 = vmatpush3.bf16.msra.mxu0 %v395_v47 }
 0x2df   :  { %547 = vmatprep.subr.bf16.mxu0 %v816_v46 }
 0x2e1   :  { %765 = vmatmul.mubr.msk.bf16.vlgmr.msra.gmra.mrb[8].mxu0 %vm92_vm1, %v1073_v2 }
 0x2e2   :  { %548 = vmatpush1.bf16.msra.mxu0 %v814_v49  ;;  %579 = vmatprep.mubr.bf16.mxu0 %v974_v30 }
 0x2e3   :  { %549 = vmatprep.subr.bf16.mxu0 %v819_v50 }
 0x2e6   :  { %550 = vmatpush1.bf16.msra.mxu0 %v817_v51 }
 0x2e7   :  { %551 = vmatprep.subr.bf16.mxu0 %v822_v52 }
 0x2ea   :  { %552 = vmatpush1.bf16.msra.mxu0 %v820_v53 }
 0x2eb   :  { %553 = vmatprep.subr.bf16.mxu0 %v825_v54 }
 0x2ee   :  { %554 = vmatpush1.bf16.msra.mxu0 %v823_v55 }
 0x2ef   :  { %555 = vmatprep.subr.bf16.mxu0 %v828_v56 }
 0x2f2   :  { %556 = vmatpush1.bf16.msra.mxu0 %v826_v57 }
 0x2f3   :  { %557 = vmatprep.subr.bf16.mxu0 %v831_v58 }
 0x2f6   :  { %558 = vmatpush1.bf16.msra.mxu0 %v829_v59 }
 0x2f7   :  { %559 = vmatprep.subr.bf16.mxu0 %v834_v60 }
 0x2fa   :  { %560 = vmatpush1.bf16.msra.mxu0 %v832_v61 }
 0x2fb   :  { %561 = vmatprep.subr.bf16.mxu0 %v837_v62 }
 0x2fe   :  { %562 = vmatpush1.bf16.msra.mxu0 %v835_v63 }
 0x3b4   :  { %v430_v1 = vpop.f32.mrb[8].mxu0 }
 0x3b5   :  { %v431_v3 = vadd.f32 %v430_v1, %v388_v44  ;;  %v766_v4 = vpop.f32.mrb[9].mxu0 }
 0x3b6   :  { %v433_v5 = vpop.f32.mrb[10].mxu0 }
 0x3b7   :  { %v443_v6 = vadd.f32 %v714_v0, %v431_v3  ;;  %v434_v7 = vadd.f32 %v433_v5, %v392_v48  ;;  %v767_v8 = vpop.f32.mrb[11].mxu0 }
 0x3b9   :  { %v444_v9 = vadd.f32 %v714_v0, %v434_v7  ;;  %v445_v10 = vmax.f32 %v443_v6, 0.0 }
 0x3bb   :  { %v446_v11 = vmax.f32 %v444_v9, 0.0 }
 0x3bd   :  { %v466_v12 = vpack.c.bf16 %v446_v11, %v445_v10 }
 0x3bf   :  { %580 = vmatmul.mubr.bf16.vlgmr.msra.gmra.mrb[12].mxu0 %v466_v12 }
 0x492   :  { %v581_v13 = vpop.f32.mrb[12].mxu0 }
 0x493   :  { %v583_v14 = vpop.f32.mrb[13].mxu0 }
 0x494   :  { %v585_v15 = vpop.f32.mrb[14].mxu0 }
 0x495   :  { %v590_v16 = vpack.c.bf16 %v585_v15, %v581_v13  ;;  %v587_v17 = vpop.f32.mrb[15].mxu0 }
 0x497   :  { %769 = vmatpush3.bf16.msra.mxu1 %v590_v16 }
 0x49a   :  { %771 = vmatmul.mubr.msk.bf16.vlgmr.msra.gmra.mrb[8].mxu1 %vm92_vm1, %v1073_v2 }
 0x56d   :  { %v625_v20 = vpop.f32.mrb[8].mxu1 }
 0x56e   :  { %v626_v22 = vadd.f32 %v625_v20, %v583_v14  ;;  %v772_v23 = vpop.f32.mrb[9].mxu1 }
 0x56f   :  { %v628_v24 = vpop.f32.mrb[10].mxu1 }
 0x570   :  { %v629_v25 = vadd.f32 %v628_v24, %v587_v17  ;;  %v773_v26 = vpop.f32.mrb[11].mxu1  ;;  %v638_v27 = vadd.f32 %v733_v21, %v626_v22 }
 0x572   :  { %v643_v28 = vsel %vm642_vm2, %v638_v27, -1e+30  ;;  %v639_v29 = vadd.f32 %v733_v21, %v629_v25 }
 0x573   :  { %645 = vmax.xlane.f32.xlu0 %v643_v28 }
 0x574   :  { %v644_v2 = vsel %vm642_vm2, %v639_v29, -1e+30 }
 0x577   :  { %647 = vmax.xlane.f32.xlu0 %v644_v2 }
 0x600   :  { %v646_v30 = vpop.xlane.xlu0 %645 }
 0x601   :  { %v649_v31 = vsub.f32 %v643_v28, %v646_v30 }
 0x603   :  { %v651_v32 = vmul.f32 1.442695, %v649_v31 }
 0x604   :  { %v648_v33 = vpop.xlane.xlu0 %647 }
 0x605   :  { %838 = vpow2.f32 %v651_v32  ;;  %v650_v34 = vsub.f32 %v644_v2, %v648_v33 }
 0x607   :  { %v653_v35 = vmul.f32 1.442695, %v650_v34 }
 0x609   :  { %840 = vpow2.f32 %v653_v35 }
 0x60f   :  { %v839_v36 = vpop.eup %838 }
 0x610   :  { %v655_v37 = vsel %vm642_vm2, %v839_v36, 0.0 }
 0x611   :  { %657 = vadd.xlane.f32.xlu1 %v655_v37 }
 0x613   :  { %v841_v38 = vpop.eup %840 }
 0x614   :  { %v656_v39 = vsel %vm642_vm2, %v841_v38, 0.0 }
 0x615   :  { %659 = vadd.xlane.f32.xlu1 %v656_v39 }
 0x69e   :  { %v658_v40 = vpop.xlane.xlu1 %657 }
 0x69f   :  { %842 = vlog2.f32 %v658_v40 }
 0x6a2   :  { %v660_v41 = vpop.xlane.xlu1 %659 }
 0x6a3   :  { %844 = vlog2.f32 %v660_v41 }
 0x6a9   :  { %v843_v42 = vpop.eup %842 }
 0x6aa   :  { %v662_v43 = vmul.f32 0.6931472, %v843_v42 }
 0x6ac   :  { %v665_v44 = vsub.f32 %v649_v31, %v662_v43 }
 0x6ad   :  { %v845_v45 = vpop.eup %844 }
 0x6ae   :  { %667 = vst [vmem:[#allocation10] sm:$0xff] %v665_v44  ;;  %v664_v46 = vmul.f32 0.6931472, %v845_v45 }
 0x6b0   :  { %v666_v47 = vsub.f32 %v650_v34, %v664_v46 }
 0x6b2   :  { %668 = vst [vmem:[#allocation10 + $0x8] sm:$0xff] %v666_v47 }
 0x6b3   :  { %945 = shalt.err (!%p942_p8)
}
 0x6b4   :  { %s946_s26 = scalar_lea.hbm %s1125_s5, 256 }
 0x6b5   :  { %p947_p9 = scmp.ne.s32.totalorder %s1125_s5, %s946_s26  ;;  %p950_p10 = scmp.lt.u32.totalorder %s946_s26, %s1125_s5 }
 0x6b7   :  { %p952_p11 = pnand %p950_p10, %p947_p9 }
 0x6b9   :  { %955 = shalt.err (!%p952_p11)
}
 0x6ba   :  { %680 = dma.vmem_to_hbm [thread:$0]  %s675_s22, 256, %s1125_s5, [#allocation4], %s969_s0, %s969_s0, %s970_s21  }
 0x6bb   :  { %962 = dma.done.wait [#allocation4], 256  }
 0x6bc   :  { %963 = vsyncadd [#allocation4], 4294967040 }
 0x6bd   :  { %684 = vsyncpa [#allocation3], 1 }
 0x6be   :  { %685 = vsyncpa [#allocation6], 1 }
 0x6bf   :  { %686 = vsyncpa [#allocation9], 1 }
 0x6c0   :  { %687 = vsyncpa [#allocation4], 1 }

</bundles_post_ra>
